<compile_context>
chip_gen: v6e
topology: v6e:2x2x1
jax: 0.10.0
libtpu: 0.0.40
codegen_flags: <defaults>
</compile_context>

<pallas_src>
import jax
import jax.numpy as jnp
from jax.experimental import pallas as pl
from jax.experimental.pallas import tpu as pltpu


def attention_kernel(x_ref, w_ref, b_ref, o_ref):
    # x_ref: (Bt, T, D)  lstm outputs block (Bt rows of the batch)
    # w_ref: (1, D)      attention projection weight (resident)
    # b_ref: (1, 1)      attention projection bias, in SMEM
    # o_ref: (Bt, D)     context vectors
    x = x_ref[...]                                    # (Bt, T, D), input dtype
    w_row = w_ref[0, :].astype(x.dtype)               # (D,)
    bias = b_ref[0, 0]                                # f32 scalar from SMEM

    # Scores (Bt, T): contract D on the VPU (multiply + lane reduce), f32
    # accumulation, no full-tile f32 temporary.
    # (On v7x this contraction could be pushed to the idle MXU instead.)
    s = jnp.sum(x * w_row, axis=-1, dtype=jnp.float32) + bias    # (Bt, T)
    e = jnp.tanh(s)                                              # (Bt, T)

    # Softmax over the sequence axis.  tanh output is bounded in [-1, 1] so
    # exp cannot overflow -> no max-subtraction needed.
    p = jnp.exp(e)                                    # (Bt, T)  unnormalized
    denom = jnp.sum(p, axis=-1, keepdims=True)        # (Bt, 1)

    # Context: contract the *unnormalized* weights with x on the MXU
    # (batched (1,T)@(T,D) per row, f32 accumulation), then normalize the
    # (Bt, D) result — cheaper than scaling the (Bt, T) weights and avoids
    # quantizing normalized alpha before the matmul.
    # (On v5e/v6e a VPU sublane-reduce `jnp.sum(x * p[:,:,None], axis=1)` is
    #  an equivalent alternative if MXU push/pop slots ever show pressure.)
    ctx = jnp.einsum(
        "bqt,btd->bqd",
        p[:, None, :].astype(x.dtype),
        x,
        preferred_element_type=jnp.float32,
    )[:, 0, :]                                        # (Bt, D) f32
    ctx = ctx * pl.reciprocal(denom, approx=False)    # normalize after contraction
    o_ref[...] = ctx.astype(o_ref.dtype)


def attention_forward(lstm_out, w, b, *,
                      target_tile_bytes=6 << 20,
                      vmem_limit_bytes=48 << 20):
    """lstm_out: (B, T, D); w: (1, D) [nn.Linear(2H, 1).weight]; b: (1,).

    Returns the (B, D) context vectors.  Defaults are cross-generation safe
    (v7x has 64 MiB VMEM per core); on v5e/v6e target_tile_bytes can be
    raised to 8-16 MiB with vmem_limit_bytes 64-96 MiB.
    """
    B, T, D = lstm_out.shape
    w = jnp.asarray(w).reshape(1, D)
    b = jnp.asarray(b).reshape(1, 1).astype(jnp.float32)     # SMEM scalar

    itemsize = lstm_out.dtype.itemsize
    sublane = {4: 8, 2: 16, 1: 32}.get(itemsize, 8)          # sublane rows per tile
    row_in = T * D * itemsize                                 # one batch row of x
    # Per-batch-row VMEM cost: double-buffered input + x*w product temp +
    # f32 score temps (s/e/p) + f32 context + double-buffered output.
    row_cost = 2 * row_in + row_in + 3 * 4 * T + 4 * D + 2 * D * itemsize
    budget = int(vmem_limit_bytes * 0.9)

    Bt = max(1, min(B, int(target_tile_bytes // max(1, row_in))))
    Bt = min(Bt, max(1, budget // max(1, row_cost)))
    if Bt >= B:
        Bt = B                       # full batch in one block (exempt from 8-rule)
    elif Bt >= sublane:
        Bt = (Bt // sublane) * sublane
    elif B <= sublane:
        Bt = B
    else:
        # TODO(synk): for very long T*D rows (even one sublane-group of rows
        # exceeds the VMEM budget) restructure to a flash-style online softmax
        # over T chunks instead of holding a (Bt, T, D) block resident.
        Bt = sublane

    # v7x megacore: prefer >= 2 grid steps when the batch is big enough so the
    # "parallel" batch axis can shard across both TensorCores.
    if Bt == B and B >= 2 * sublane:
        Bt = pl.cdiv(pl.cdiv(B, 2), sublane) * sublane

    grid = (pl.cdiv(B, Bt),)         # ragged final block handled by Pallas

    out = pl.pallas_call(
        attention_kernel,
        out_shape=jax.ShapeDtypeStruct((B, D), lstm_out.dtype),
        grid=grid,
        in_specs=[
            pl.BlockSpec((Bt, T, D), lambda i: (i, 0, 0)),
            pl.BlockSpec((1, D), lambda i: (0, 0)),
            pl.BlockSpec(memory_space=pltpu.MemorySpace.SMEM),
        ],
        out_specs=pl.BlockSpec((Bt, D), lambda i: (i, 0)),
        compiler_params=pltpu.CompilerParams(
            dimension_semantics=("parallel",),
            vmem_limit_bytes=vmem_limit_bytes,
        ),
    )(lstm_out, w, b)
    return out


def attention_reference(lstm_out, w, b):
    # Matches the PyTorch module: tanh(Linear(x)), softmax over T, weighted sum.
    e = jnp.tanh(jnp.einsum("btd,d->bt", lstm_out, w[0]) + b[0])   # (B, T)
    alpha = jax.nn.softmax(e, axis=-1)                             # over seq axis
    return jnp.einsum("bt,btd->bd", alpha, lstm_out)               # (B, D)


if __name__ == "__main__":
    hidden_dim = 16
    B, T, D = 2, 8, 2 * hidden_dim

    key = jax.random.PRNGKey(0)
    k_x, k_w, k_b = jax.random.split(key, 3)

    lstm_out = jax.random.normal(k_x, (B, T, D), dtype=jnp.float32)
    # nn.Linear(2*hidden, 1): weight (1, 2H), bias (1,)
    w = jax.random.normal(k_w, (1, D), dtype=jnp.float32) * 0.1
    b = jax.random.normal(k_b, (1,), dtype=jnp.float32) * 0.1

    out = jax.block_until_ready(attention_forward(lstm_out, w, b))
    ref = attention_reference(lstm_out, w, b)

    assert out.shape == (B, D)
    assert jnp.allclose(out, ref, atol=1e-4, rtol=1e-4), (out, ref)

    print("KERNEL_OK")
</pallas_src>

<mosaic_0001>
module attributes {stable_mosaic.version = 11 : i64} {
  func.func @attention_kernel(%arg0: i32, %arg1: memref<2x8x32xf32, #tpu.memory_space<vmem>>, %arg2: memref<1x32xf32, #tpu.memory_space<vmem>>, %arg3: memref<1x1xf32, #tpu.memory_space<smem>>, %arg4: memref<2x32xf32, #tpu.memory_space<vmem>>) attributes {dimension_semantics = [#tpu.dimension_semantics<parallel>], iteration_bounds = array<i64: 1>, scalar_prefetch = 0 : i64, scratch_operands = 0 : i64, tpu.core_type = #tpu.core_type<tc>, window_params = [{transform_indices = @transform_0, window_bounds = array<i64: 2, 8, 32>}, {pipeline_mode = #tpu.pipeline_mode<synchronous>, transform_indices = @transform_1, window_bounds = array<i64: 1, 32>}, {transform_indices = @transform_2, window_bounds = array<i64: 1, 1>}, {transform_indices = @transform_3, window_bounds = array<i64: 2, 32>}]} {
    %c0 = arith.constant 0 : index
    %c0_0 = arith.constant 0 : index
    %c0_1 = arith.constant 0 : index
    %0 = vector.load %arg1[%c0, %c0_0, %c0_1] : memref<2x8x32xf32, #tpu.memory_space<vmem>>, vector<2x8x32xf32>
    %c0_2 = arith.constant 0 : index
    %c0_3 = arith.constant 0 : index
    %1 = vector.load %arg2[%c0_2, %c0_3] : memref<1x32xf32, #tpu.memory_space<vmem>>, vector<1x32xf32>
    %2 = vector.shape_cast %1 : vector<1x32xf32> to vector<32xf32>
    %c0_4 = arith.constant 0 : index
    %c0_5 = arith.constant 0 : index
    %3 = memref.load %arg3[%c0_4, %c0_5] : memref<1x1xf32, #tpu.memory_space<smem>>
    %4 = vector.shape_cast %2 : vector<32xf32> to vector<1x1x32xf32>
    %5 = vector.broadcast %4 : vector<1x1x32xf32> to vector<2x8x32xf32>
    %6 = arith.mulf %0, %5 : vector<2x8x32xf32>
    %cst = arith.constant dense<0.000000e+00> : vector<2x8xf32>
    %7 = vector.multi_reduction <add>, %6, %cst [2] : vector<2x8x32xf32> to vector<2x8xf32>
    %8 = vector.broadcast %3 : f32 to vector<2x8xf32>
    %9 = arith.addf %7, %8 : vector<2x8xf32>
    %10 = math.tanh %9 : vector<2x8xf32>
    %11 = math.exp %10 : vector<2x8xf32>
    %cst_6 = arith.constant dense<0.000000e+00> : vector<2xf32>
    %12 = vector.multi_reduction <add>, %11, %cst_6 [1] : vector<2x8xf32> to vector<2xf32>
    %13 = vector.shape_cast %12 : vector<2xf32> to vector<2x1xf32>
    %14 = vector.shape_cast %11 : vector<2x8xf32> to vector<2x1x8xf32>
    "tpu.trace_start"() <{level = 10 : i32, message = "bqt,btd->bqd"}> : () -> ()
    %cst_7 = arith.constant dense<0.000000e+00> : vector<2x1x32xf32>
    %15 = tpu.matmul %14, %0, %cst_7 {dimension_numbers = #tpu.dot_dimension_numbers<[2], [1], [1], [2], [0, 0, 0, 1, 1, 2], [0], [0]>} : vector<2x1x8xf32>, vector<2x8x32xf32>, vector<2x1x32xf32> -> vector<2x1x32xf32>
    "tpu.trace_stop"() : () -> ()
    %16 = vector.shape_cast %15 : vector<2x1x32xf32> to vector<2x32xf32>
    %17 = tpu.reciprocal %13 : vector<2x1xf32> -> vector<2x1xf32>
    %18 = vector.broadcast %17 : vector<2x1xf32> to vector<2x32xf32>
    %19 = arith.mulf %16, %18 : vector<2x32xf32>
    %c0_8 = arith.constant 0 : index
    %c0_9 = arith.constant 0 : index
    %20 = vector.load %arg4[%c0_8, %c0_9] : memref<2x32xf32, #tpu.memory_space<vmem>>, vector<2x32xf32>
    tpu.vector_store %arg4[%c0_8, %c0_9], %19 {strides = array<i32>} : memref<2x32xf32, #tpu.memory_space<vmem>>, vector<2x32xf32>,
    return
  }
  func.func @transform_0(%arg0: i32) -> (i32, i32, i32) {
    %c0_i32 = arith.constant 0 : i32
    %c0_i32_0 = arith.constant 0 : i32
    %c0_i32_1 = arith.constant 0 : i32
    return %arg0, %c0_i32, %c0_i32_0 : i32, i32, i32
  }
  func.func @transform_1(%arg0: i32) -> (i32, i32) {
    %c0_i32 = arith.constant 0 : i32
    %c0_i32_0 = arith.constant 0 : i32
    %c0_i32_1 = arith.constant 0 : i32
    return %c0_i32, %c0_i32_0 : i32, i32
  }
  func.func @transform_2(%arg0: i32) -> (i32, i32) {
    %c0_i32 = arith.constant 0 : i32
    %c0_i32_0 = arith.constant 0 : i32
    %c0_i32_1 = arith.constant 0 : i32
    return %c0_i32, %c0_i32_0 : i32, i32
  }
  func.func @transform_3(%arg0: i32) -> (i32, i32) {
    %c0_i32 = arith.constant 0 : i32
    %c0_i32_0 = arith.constant 0 : i32
    return %arg0, %c0_i32 : i32, i32
  }
}

</mosaic_0001>

<bundles_post_ra>
// kernel: tpu_custom_call.1
= control target key start
LH: loop header
LB: loop body
LE: loop exit
PB: predicated region body
PF: predicated region fallthrough
CT: control target
= control target key end

     0   :  { %9 = vsyncpa [#allocation4], 0  ;;  %s368_s0 = inlined_call_operand.hbm [shape: f32[2,8,32], index: 0, kind: input, shape index: {}]   ;;  %s369_s1 = inlined_call_operand.vmem [shape: f32[1,32], index: 1, kind: input, shape index: {}]   ;;  %s370_s2 = inlined_call_operand.<no memory space> [shape: f32[1,1], index: 2, kind: input, shape index: {}]   ;;  %s371_s3 = inlined_call_operand.hbm [shape: f32[2,32], index: 3, kind: output, shape index: {}]  }
   0x1   :  { %10 = vsyncpa [#allocation5], 0  ;;  %s328_s12 = smov [#allocation3]  }
   0x2   :  { %s16_s13 = sshll.u32 %s328_s12, 4  ;;  %s17_s13 = int_to_ptr.vmem [resolvable:$true] %s16_s13 }
   0x3   :  { %s292_s14 = scalar_lea.vmem %s17_s13, 256  ;;  %p297_p1 = scmp.lt.s32.totalorder %s17_s13, %s17_s13 }
   0x4   :  { %p293_p0 = scmp.ne.s32.totalorder %s17_s13, %s292_s14  ;;  %p298_p2 = scmp.lt.s32.totalorder %s292_s14, %s292_s14 }
   0x6   :  { %p299_p3 = por %p298_p2, %p297_p1 }
   0x8   :  { %p300_p4 = pnand %p299_p3, %p293_p0 }
   0xa   :  { %303 = shalt.err (!%p300_p4)
}
   0xb   :  { %s329_s15 = smov 128   ;;  %s330_s16 = smov 8  }
   0xc   :  { %22 = dma.hbm_to_vmem [thread:$0]  %s368_s0, 256, %s17_s13, [#allocation4], %s329_s15, %s329_s15, %s330_s16  }
   0xd   :  { %324 = dma.done.wait [#allocation4], 256  }
   0xe   :  { %325 = vsyncadd [#allocation4], 4294967040  ;;  %v31_v0 = vld [vmem:[#allocation3 + $0x8] sm:$0xff]  ;;  %v251_v1 = vld [vmem:[%s369_s1] ss:$0 sm:$0xff]  ;;  %vm42_vm0 = vcmask 261120   ;;  %v49_v8 = vstv %s370_s2  ;;  %v60_v17 = vlaneseq }
   0xf   :  { %v30_v2 = vld [vmem:[#allocation3] sm:$0xff]  ;;  %v41_v3 = vmul.f32 %v251_v1, %v31_v0  ;;  %v331_v7 = vmov 0.0   ;;  %vm332_vm1 = vmmov 0   ;;  %vm77_vm2 = vcmask 64512   ;;  %s333_s1 = smov [#allocation6]  }
  0x10   :  { %v40_v4 = vmul.f32 %v251_v1, %v30_v2  ;;  %263 = vmatprep.subr.mxu1 %v331_v7  ;;  %265 = vmatprep.mubr.msk.f32.mxu1 %vm332_vm1, %v331_v7  ;;  %v61_v18 = vand.u32 127, %v60_v17  ;;  %v63_v19 = vshrl.u32 %v60_v17, 7  ;;  %vm70_vm3 = vcmask 1041409   ;;  %s242_s2 = sshll.u32 %s333_s1, 4  ;;  %s243_s2 = int_to_ptr.vmem [resolvable:$true] %s242_s2 }
  0x11   :  { %v46_v5 = vsel %vm42_vm0, %v41_v3, 0.0  ;;  %264 = vmatpush3.msra.mxu1 %v31_v0  ;;  %258 = vmatprep.subr.mxu0 %v331_v7  ;;  %vm73_vm4 = vcmask 58368   ;;  %vm234_vm5 = vcmask 254976   ;;  %s304_s22 = scalar_lea.vmem %s243_s2, 32  ;;  %p309_p6 = scmp.lt.s32.totalorder %s243_s2, %s243_s2 }
  0x12   :  { %47 = vadd.xlane.f32.xlu0 %v46_v5  ;;  %v43_v6 = vsel %vm42_vm0, %v40_v4, 0.0  ;;  %259 = vmatpush3.msra.mxu0 %v30_v2  ;;  %v64_v20 = vsub.s32 %v61_v18, %v63_v19  ;;  %p305_p5 = scmp.ne.s32.totalorder %s243_s2, %s304_s22  ;;  %p310_p7 = scmp.lt.s32.totalorder %s304_s22, %s304_s22 }
  0x13   :  { %260 = vmatprep.mubr.msk.f32.mxu0 %vm332_vm1, %v331_v7 }
  0x14   :  { %p311_p8 = por %p310_p7, %p309_p6 }
  0x16   :  { %44 = vadd.xlane.f32.xlu0 %v43_v6  ;;  %p312_p9 = pnand %p311_p8, %p305_p5 }
  0x9b   :  { %v48_v9 = vpop.xlane.xlu0 %47 }
  0x9c   :  { %v51_v10 = vadd.f32 %v49_v8, %v48_v9 }
  0x9e   :  { %274 = vtanh.f32 %v51_v10 }
  0x9f   :  { %v45_v11 = vpop.xlane.xlu0 %44 }
  0xa0   :  { %v50_v12 = vadd.f32 %v49_v8, %v45_v11 }
  0xa2   :  { %276 = vtanh.f32 %v50_v12 }
  0xab   :  { %v275_v13 = vpop.eup %274 }
  0xac   :  { %v56_v14 = vmul.f32 1.442695, %v275_v13 }
  0xae   :  { %278 = vpow2.f32 %v56_v14 }
  0xaf   :  { %v277_v15 = vpop.eup %276 }
  0xb0   :  { %v54_v16 = vmul.f32 1.442695, %v277_v15 }
  0xb2   :  { %280 = vpow2.f32 %v54_v16 }
  0xbb   :  { %v279_v21 = vpop.eup %278 }
  0xbc   :  { %v69_v22 = vrot.slane %v279_v21, %v64_v20 }
  0xbe   :  { %266 = vmatmul.mubr.msk.f32.vlgmr.msra.gmra.mxu1 %vm77_vm2, %v69_v22 }
  0xbf   :  { %v281_v23 = vpop.eup %280 }
  0xc0   :  { %v65_v24 = vrot.slane %v281_v23, %v64_v20 }
  0xc2   :  { %261 = vmatmul.mubr.msk.f32.vlgmr.msra.gmra.mxu0 %vm77_vm2, %v65_v24  ;;  %v71_v25 = vsel %vm70_vm3, %v69_v22, %v65_v24 }
  0xc3   :  { %v74_v26 = vsel %vm73_vm4, %v71_v25, 0.0 }
  0xc4   :  { %75 = vadd.xlane.f32.xlu1 %v74_v26 }
 0x14d   :  { %v76_v27 = vpop.xlane.xlu1 %75 }
 0x14e   :  { %282 = vrcp.f32 %v76_v27 }
 0x15b   :  { %v283_v28 = vpop.eup %282 }
 0x15c   :  { %v224_v29 = vrot.slane %v283_v28, 1 }
 0x17e   :  { %v218_v30 = vpop.f32.mrf.mxu1 }
 0x17f   :  { %v228_v31 = vmul.f32 %v224_v29, %v218_v30 }
 0x180   :  { %v267_v32 = vpop.f32.mrf.mxu1 }
 0x181   :  { %v231_v34 = vrot.slane %v228_v31, 7 }
 0x182   :  { %v146_v33 = vpop.f32.mrf.mxu0 }
 0x183   :  { %v227_v35 = vmul.f32 %v283_v28, %v146_v33 }
 0x184   :  { %v262_v36 = vpop.f32.mrf.mxu0 }
 0x185   :  { %v232_v37 = vsel %vm70_vm3, %v231_v34, %v227_v35 }
 0x186   :  { %235 = vst.msk [vmem:[#allocation6] sm:$0x3] %vm234_vm5, %v232_v37 }
 0x187   :  { %315 = shalt.err (!%p312_p9)
}
 0x188   :  { %245 = dma.vmem_to_hbm [thread:$0]  %s243_s2, 32, %s371_s3, [#allocation5]  }
 0x189   :  { %326 = dma.done.wait [#allocation5], 32  }
 0x18a   :  { %327 = vsyncadd [#allocation5], 4294967264 }
 0x18b   :  { %249 = vsyncpa [#allocation4], 1 }
 0x18c   :  { %250 = vsyncpa [#allocation5], 1 }

</bundles_post_ra>
